<compile_context>
chip_gen: v7x
topology: tpu7x:2x2x1
jax: 0.10.0
libtpu: 0.0.40
codegen_flags: <defaults>
</compile_context>

<pallas_src>
import functools

import jax
import jax.numpy as jnp
from jax.experimental import pallas as pl
from jax.experimental.pallas import tpu as pltpu


def _round_up(n, m):
    return ((n + m - 1) // m) * m


def _has_bf16_vpu():
    """bf16 VPU/EUP exists on v6e and newer; v5e and older lack it."""
    try:
        kind = jax.devices()[0].device_kind.lower()
    except Exception:
        return False
    return ("v6" in kind) or ("v7" in kind)


def _coeff_decoder_kernel(x_ref, w1_ref, b1_ref, w2_ref, b2_ref, o_ref):
    # fc1: MXU accumulates in f32; the bias-add + tanh epilogue runs in b1's dtype
    # (f32, or bf16 on v6e/v7x when the bf16 param path is used) so h feeds the
    # second matmul with no additional cast.
    acc1 = jnp.dot(x_ref[...].astype(w1_ref.dtype), w1_ref[...],
                   preferred_element_type=jnp.float32)
    h = jnp.tanh(acc1.astype(b1_ref.dtype) + b1_ref[...])
    # fc2 (the merger / coeff_distributer layer is folded into w2/b2 at prep time).
    # TODO(synk): the PyTorch module prints out[0] once (self.flag); debug print elided.
    out = (jnp.dot(h.astype(w2_ref.dtype), w2_ref[...],
                   preferred_element_type=jnp.float32)
           + b2_ref[...].astype(jnp.float32))
    o_ref[...] = out.astype(o_ref.dtype)


def prepare_params(params, merger=True, compute_dtype=jnp.float32,
                   bf16_epilogue=None):
    """One-time param prep: fold the linear merger layer into fc2 and pick dtypes.

    Input weights are stored [in_features, out_features] (W^T relative to PyTorch),
    biases [1, out_features].  Weights are returned in `compute_dtype`; b1's dtype
    selects the fc1 epilogue precision (bf16 only where the VPU/EUP supports it),
    b2 / the final accumulate stay f32.
    """
    w1 = jnp.asarray(params["w1"], jnp.float32)
    b1 = jnp.asarray(params["b1"], jnp.float32)
    w2 = jnp.asarray(params["w2"], jnp.float32)
    b2 = jnp.asarray(params["b2"], jnp.float32)
    if merger:
        w3 = jnp.asarray(params["w3"], jnp.float32)
        b3 = jnp.asarray(params["b3"], jnp.float32)
        # No nonlinearity between fc2 and coeff_distributer:
        #   (h @ W2 + b2) @ W3 + b3 == h @ (W2 @ W3) + (b2 @ W3 + b3)
        w2, b2 = w2 @ w3, b2 @ w3 + b3

    if bf16_epilogue is None:
        bf16_epilogue = (jnp.dtype(compute_dtype) == jnp.dtype(jnp.bfloat16)
                         and _has_bf16_vpu())
    ep_dtype = jnp.bfloat16 if bf16_epilogue else jnp.float32

    return {
        "w1": w1.astype(compute_dtype),
        "b1": b1.astype(ep_dtype),   # epilogue (bias + tanh) dtype
        "w2": w2.astype(compute_dtype),
        "b2": b2,                    # f32: final accumulate/bias stay f32
    }


@functools.partial(jax.jit, static_argnames=("block_b", "min_pallas_batch"))
def coeff_decoder(x, prepared, *, block_b=1024, min_pallas_batch=64):
    """Pallas implementation of CoeffDecoder.forward.

    x: [B, latent_dimension]; prepared: output of prepare_params().
    Returns [B, coeffs_size] in x.dtype.
    """
    w1, b1, w2, b2 = prepared["w1"], prepared["b1"], prepared["w2"], prepared["b2"]
    B, L = x.shape
    H = w1.shape[1]
    C = w2.shape[1]

    if B < min_pallas_batch:
        # Latency-bound regime: fixed pallas_call / DMA overhead dominates two tiny
        # GEMMs, so let XLA fuse them directly.
        h = jnp.tanh(jnp.dot(x.astype(w1.dtype), w1,
                             preferred_element_type=jnp.float32).astype(b1.dtype)
                     + b1)
        out = (jnp.dot(h.astype(w2.dtype), w2, preferred_element_type=jnp.float32)
               + b2.astype(jnp.float32))
        return out.astype(x.dtype)

    # Batch tiling: tiny B -> one full-extent block; otherwise split into >=2 steps
    # (so both v7x TensorCores get work via the "parallel" axis), capped at block_b
    # and kept a multiple of 8 for sublane alignment.
    if B < 16:
        tb = B
    else:
        tb = min(block_b, _round_up(pl.cdiv(B, 2), 8))
    nb = pl.cdiv(B, tb)

    x_isz = jnp.dtype(x.dtype).itemsize
    w_isz = jnp.dtype(w1.dtype).itemsize
    b1_isz = jnp.dtype(b1.dtype).itemsize
    cost = pl.CostEstimate(
        flops=2 * B * (L * H + H * C),
        transcendentals=B * H,
        bytes_accessed=(B * L * x_isz + B * C * x_isz
                        + (L * H + H * C) * w_isz + H * b1_isz + C * 4),
    )

    def _full(a):
        # Full-extent block, constant index map -> resident in VMEM across the grid.
        return pl.BlockSpec(a.shape, lambda i: (0,) * a.ndim)

    out = pl.pallas_call(
        _coeff_decoder_kernel,
        out_shape=jax.ShapeDtypeStruct((B, C), x.dtype),
        grid=(nb,),
        in_specs=[
            pl.BlockSpec((tb, L), lambda i: (i, 0)),   # x tiled over batch rows
            _full(w1), _full(b1), _full(w2), _full(b2),
        ],
        # Unpadded output: last dim equals the full array dim (legal at any width),
        # so no padded writeback and no wrapper slice.
        out_specs=pl.BlockSpec((tb, C), lambda i: (i, 0)),
        compiler_params=pltpu.CompilerParams(
            dimension_semantics=("parallel",),          # megacore sharding on v7x
            vmem_limit_bytes=32 * 1024 * 1024,          # safe under v7x's 64 MiB VMEM
        ),
        cost_estimate=cost,
    )(x, w1, b1, w2, b2)
    return out


def init_params(key, latent_dimension, hidden_dim, coeffs_size, merger=True,
                dtype=jnp.float32):
    """Deterministic init mimicking nn.Linear's default U(-1/sqrt(fan_in), 1/sqrt(fan_in)).

    Weights stored as [in_features, out_features] (W^T relative to PyTorch).
    """
    def linear(key, fan_in, fan_out):
        kw, kb = jax.random.split(key)
        bound = 1.0 / jnp.sqrt(fan_in)
        w = jax.random.uniform(kw, (fan_in, fan_out), dtype, -bound, bound)
        b = jax.random.uniform(kb, (1, fan_out), dtype, -bound, bound)
        return w, b

    k1, k2, k3 = jax.random.split(key, 3)
    w1, b1 = linear(k1, latent_dimension, hidden_dim)
    w2, b2 = linear(k2, hidden_dim, coeffs_size)
    params = {"w1": w1, "b1": b1, "w2": w2, "b2": b2}
    if merger:
        w3, b3 = linear(k3, coeffs_size, coeffs_size)
        params["w3"] = w3
        params["b3"] = b3
    return params


def coeff_decoder_ref(x, params, merger=True):
    """Pure-JAX reference (unfolded, exactly mirrors the PyTorch forward)."""
    out = jnp.tanh(x @ params["w1"] + params["b1"])
    out = out @ params["w2"] + params["b2"]
    if merger:
        out = out @ params["w3"] + params["b3"]
    return out


if __name__ == "__main__":
    # Shapes consistent with the module's forward.
    latent_dimension = 8
    hidden_dim = 32
    coeffs_size = 16
    merger = True

    key = jax.random.PRNGKey(0)
    kx, kp = jax.random.split(key)
    params = init_params(kp, latent_dimension, hidden_dim, coeffs_size, merger)

    # --- Pallas path: batch large enough to beat launch overhead and exercise the
    #     2-step grid (feeds both v7x TensorCores). -----------------------------
    B = 256
    x = jax.random.normal(kx, (B, latent_dimension), dtype=jnp.float32)
    prepared = prepare_params(params, merger=merger)
    out = jax.block_until_ready(coeff_decoder(x, prepared))
    ref = coeff_decoder_ref(x, params, merger=merger)
    assert out.shape == (B, coeffs_size)
    assert jnp.allclose(out, ref, atol=1e-4, rtol=1e-4), "f32 mismatch vs reference"

    # bf16-weight path (bf16 epilogue auto-enabled on v6e/v7x, f32 epilogue on v5e);
    # bf16 x halves the input HBM stream, output comes back in bf16.
    prepared_bf16 = prepare_params(params, merger=merger, compute_dtype=jnp.bfloat16)
    out_bf16 = jax.block_until_ready(
        coeff_decoder(x.astype(jnp.bfloat16), prepared_bf16))
    assert jnp.allclose(out_bf16.astype(jnp.float32), ref, atol=1e-1, rtol=1e-1), \
        "bf16 mismatch vs reference"

    # merger=False reuses the same 2-matmul kernel (nothing to fold).
    prepared_nm = prepare_params(params, merger=False)
    out_nm = jax.block_until_ready(coeff_decoder(x, prepared_nm))
    ref_nm = coeff_decoder_ref(x, params, merger=False)
    assert jnp.allclose(out_nm, ref_nm, atol=1e-4, rtol=1e-4), "no-merger mismatch"

    # --- tiny batch: default wrapper bypasses Pallas (latency-bound regime). ---
    x_small = x[:2]
    out_small = jax.block_until_ready(coeff_decoder(x_small, prepared))
    assert jnp.allclose(out_small, ref[:2], atol=1e-4, rtol=1e-4), "bypass mismatch"

    # Also force the Pallas kernel at tiny batch (tb == B full-extent block) to
    # check the full-dim-block path.
    out_small_pl = jax.block_until_ready(
        coeff_decoder(x_small, prepared, min_pallas_batch=0))
    assert jnp.allclose(out_small_pl, ref[:2], atol=1e-4, rtol=1e-4), \
        "tiny-batch Pallas mismatch"

    print("KERNEL_OK")
</pallas_src>

<mosaic_0001>
module attributes {stable_mosaic.version = 11 : i64} {
  func.func @_coeff_decoder_kernel(%arg0: i32, %arg1: memref<128x8xf32, #tpu.memory_space<vmem>>, %arg2: memref<8x32xf32, #tpu.memory_space<vmem>>, %arg3: memref<1x32xf32, #tpu.memory_space<vmem>>, %arg4: memref<32x16xf32, #tpu.memory_space<vmem>>, %arg5: memref<1x16xf32, #tpu.memory_space<vmem>>, %arg6: memref<128x16xf32, #tpu.memory_space<vmem>>) attributes {dimension_semantics = [#tpu.dimension_semantics<parallel>], iteration_bounds = array<i64: 2>, scalar_prefetch = 0 : i64, scratch_operands = 0 : i64, tpu.core_type = #tpu.core_type<tc>, window_params = [{transform_indices = @transform_0, window_bounds = array<i64: 128, 8>}, {pipeline_mode = #tpu.pipeline_mode<synchronous>, transform_indices = @transform_1, window_bounds = array<i64: 8, 32>}, {pipeline_mode = #tpu.pipeline_mode<synchronous>, transform_indices = @transform_2, window_bounds = array<i64: 1, 32>}, {pipeline_mode = #tpu.pipeline_mode<synchronous>, transform_indices = @transform_3, window_bounds = array<i64: 32, 16>}, {pipeline_mode = #tpu.pipeline_mode<synchronous>, transform_indices = @transform_4, window_bounds = array<i64: 1, 16>}, {transform_indices = @transform_5, window_bounds = array<i64: 128, 16>}]} {
    %c0 = arith.constant 0 : index
    %c0_0 = arith.constant 0 : index
    %0 = vector.load %arg1[%c0, %c0_0] : memref<128x8xf32, #tpu.memory_space<vmem>>, vector<128x8xf32>
    %c0_1 = arith.constant 0 : index
    %c0_2 = arith.constant 0 : index
    %1 = vector.load %arg2[%c0_1, %c0_2] : memref<8x32xf32, #tpu.memory_space<vmem>>, vector<8x32xf32>
    %cst = arith.constant dense<0.000000e+00> : vector<128x32xf32>
    %2 = tpu.matmul %0, %1, %cst {dimension_numbers = #tpu.dot_dimension_numbers<[1], [0], [0], [1], [0, 0, 1, 1], [], []>} : vector<128x8xf32>, vector<8x32xf32>, vector<128x32xf32> -> vector<128x32xf32>
    %c0_3 = arith.constant 0 : index
    %c0_4 = arith.constant 0 : index
    %3 = vector.load %arg3[%c0_3, %c0_4] : memref<1x32xf32, #tpu.memory_space<vmem>>, vector<1x32xf32>
    %4 = vector.broadcast %3 : vector<1x32xf32> to vector<128x32xf32>
    %5 = arith.addf %2, %4 : vector<128x32xf32>
    %6 = math.tanh %5 : vector<128x32xf32>
    %c0_5 = arith.constant 0 : index
    %c0_6 = arith.constant 0 : index
    %7 = vector.load %arg4[%c0_5, %c0_6] : memref<32x16xf32, #tpu.memory_space<vmem>>, vector<32x16xf32>
    %cst_7 = arith.constant dense<0.000000e+00> : vector<128x16xf32>
    %8 = tpu.matmul %6, %7, %cst_7 {dimension_numbers = #tpu.dot_dimension_numbers<[1], [0], [0], [1], [0, 0, 1, 1], [], []>} : vector<128x32xf32>, vector<32x16xf32>, vector<128x16xf32> -> vector<128x16xf32>
    %c0_8 = arith.constant 0 : index
    %c0_9 = arith.constant 0 : index
    %9 = vector.load %arg5[%c0_8, %c0_9] : memref<1x16xf32, #tpu.memory_space<vmem>>, vector<1x16xf32>
    %10 = vector.broadcast %9 : vector<1x16xf32> to vector<128x16xf32>
    %11 = arith.addf %8, %10 : vector<128x16xf32>
    %c0_10 = arith.constant 0 : index
    %c0_11 = arith.constant 0 : index
    %12 = vector.load %arg6[%c0_10, %c0_11] : memref<128x16xf32, #tpu.memory_space<vmem>>, vector<128x16xf32>
    tpu.vector_store %arg6[%c0_10, %c0_11], %11 {strides = array<i32>} : memref<128x16xf32, #tpu.memory_space<vmem>>, vector<128x16xf32>,
    return
  }
  func.func @transform_0(%arg0: i32) -> (i32, i32) {
    %c0_i32 = arith.constant 0 : i32
    %c0_i32_0 = arith.constant 0 : i32
    return %arg0, %c0_i32 : i32, i32
  }
  func.func @transform_1(%arg0: i32) -> (i32, i32) {
    %c0_i32 = arith.constant 0 : i32
    %c0_i32_0 = arith.constant 0 : i32
    %c0_i32_1 = arith.constant 0 : i32
    return %c0_i32, %c0_i32_0 : i32, i32
  }
  func.func @transform_2(%arg0: i32) -> (i32, i32) {
    %c0_i32 = arith.constant 0 : i32
    %c0_i32_0 = arith.constant 0 : i32
    %c0_i32_1 = arith.constant 0 : i32
    return %c0_i32, %c0_i32_0 : i32, i32
  }
  func.func @transform_3(%arg0: i32) -> (i32, i32) {
    %c0_i32 = arith.constant 0 : i32
    %c0_i32_0 = arith.constant 0 : i32
    %c0_i32_1 = arith.constant 0 : i32
    return %c0_i32, %c0_i32_0 : i32, i32
  }
  func.func @transform_4(%arg0: i32) -> (i32, i32) {
    %c0_i32 = arith.constant 0 : i32
    %c0_i32_0 = arith.constant 0 : i32
    %c0_i32_1 = arith.constant 0 : i32
    return %c0_i32, %c0_i32_0 : i32, i32
  }
  func.func @transform_5(%arg0: i32) -> (i32, i32) {
    %c0_i32 = arith.constant 0 : i32
    %c0_i32_0 = arith.constant 0 : i32
    return %arg0, %c0_i32 : i32, i32
  }
}

</mosaic_0001>

<bundles_post_ra>
// kernel: coeff_decoder.1
= control target key start
LH: loop header
LB: loop body
LE: loop exit
PB: predicated region body
PF: predicated region fallthrough
CT: control target
= control target key end

     0   :  { %s966_s18 = smov 0   ;;  %s1113_s0 = inlined_call_operand.vmem [shape: f32[256,8], index: 0, kind: input, shape index: {}]   ;;  %s1114_s1 = inlined_call_operand.vmem [shape: f32[8,32], index: 1, kind: input, shape index: {}]   ;;  %s1115_s2 = inlined_call_operand.vmem [shape: f32[1,32], index: 2, kind: input, shape index: {}]   ;;  %s1116_s3 = inlined_call_operand.vmem [shape: f32[32,16], index: 3, kind: input, shape index: {}]   ;;  %s1117_s4 = inlined_call_operand.vmem [shape: f32[1,16], index: 4, kind: input, shape index: {}]   ;;  %s1118_s5 = inlined_call_operand.vmem [shape: f32[256,16], index: 5, kind: output, shape index: {}]  }
   0x1 LB: > { %s740_s19 = sadd.s32 4294967295, %s934_s18   ;;  %p744_p0 = scmp.ge.s32.totalorder %s934_s18, 1  ;;  %s934_s18 = sphi %s966_s18, %s15_s18  }
   0x2   : > { %p188_p1 = scmp.lt.s32.totalorder %s934_s18, 3 }
   0x4   : > { %p189_p2 = pnand %p744_p0, %p188_p1 }
   0x5   : > { %v244_v0 = vld [vmem:[%s1114_s1] sm:$0xff] (!%p189_p2)  ;;  %s745_s22 = sshll.u32 (!%p189_p2), %s740_s19, 4  ;;  %vm252_vm0 = vcmask (!%p189_p2), 64512   ;;  %v463_v18 = vld [vmem:[%s1116_s3 + $0x8] sm:$0xff] (!%p189_p2)  ;;  %v464_v20 = vld [vmem:[%s1116_s3 + $0x10] sm:$0xff] (!%p189_p2)  ;;  %vm473_vm1 = vcmask (!%p189_p2), 261120  }
   0x6   : > { %192 = sbr.rel (%p189_p2) target bundleno = 489 (0x1e9), region = 40  ;;  %822 = vmatprep.subr.mxu0 (!%p189_p2), %v244_v0  ;;  %p217_p3 = scmp.lt.s32.totalorder (!%p189_p2), %s745_s22, 31  ;;  %v462_v17 = vld [vmem:[%s1116_s3] sm:$0xff] (!%p189_p2)  ;;  %v465_v21 = vld [vmem:[%s1116_s3 + $0x18] sm:$0xff] (!%p189_p2)  ;;  %vm667_vm2 = vcmask (!%p189_p2), 130048  }
   0x7   : > { %823 = vmatpush3.msra.mxu0 (!%p189_p2), %v244_v0  ;;  %v880_v19 = vpack.c.bf16 (!%p189_p2), %v463_v18, %v462_v17  ;;  %v884_v22 = vpack.c.bf16 (!%p189_p2), %v465_v21, %v464_v20  ;;  %v1034_v23 = vld [vmem:[%s1115_s2] ss:$0 sm:$0xff] (!%p189_p2) }
   0x9   : > { %881 = vmatprep.subr.bf16.mxu1 (!%p189_p2), %v880_v19 }
   0xa   : > { %883 = vmatpush3.bf16.msra.mxu1 (!%p189_p2), %v880_v19 }
   0xb   : > { %885 = vmatprep.subr.bf16.mxu1 (!%p189_p2), %v884_v22 }
   0xd   : > { %s1120_s22 = smov (!%p217_p3, %s745_s22), 31 }
   0xe   : > { %s746_s23 = sshll.u32 %s1120_s22, 3  ;;  %887 = vmatpush3.bf16.msra.mxu1 %v884_v22 }
   0xf   : > { %s985_s26 = scalar_lea.vmem %s1113_s0, %s746_s23  ;;  %s1076_s16 = scalar_lea.vmem %s1118_s5, %s746_s23 }
  0x10   : > { %v228_v1 = vld [vmem:[%s985_s26] sm:$0xff]  ;;  %v229_v2 = vld [vmem:[%s985_s26 + $0x8] sm:$0xff]  ;;  %v230_v3 = vld [vmem:[%s985_s26 + $0x10] sm:$0xff] }
  0x11   : > { %824 = vmatprep.mubr.msk.f32.mxu0 %vm252_vm0, %v228_v1  ;;  %v231_v4 = vld [vmem:[%s985_s26 + $0x18] sm:$0xff]  ;;  %v232_v5 = vld [vmem:[%s985_s26 + $0x20] sm:$0xff]  ;;  %v233_v6 = vld [vmem:[%s985_s26 + $0x28] sm:$0xff] }
  0x12   : > { %825 = vmatmul.mubr.msk.f32.vlgmr.msra.gmra.mrb[0].mxu0 %vm252_vm0, %v229_v2  ;;  %v234_v7 = vld [vmem:[%s985_s26 + $0x30] sm:$0xff]  ;;  %v235_v8 = vld [vmem:[%s985_s26 + $0x38] sm:$0xff]  ;;  %v236_v9 = vld [vmem:[%s985_s26 + $0x40] sm:$0xff] }
  0x13   : > { %827 = vmatprep.mubr.msk.f32.mxu0 %vm252_vm0, %v230_v3  ;;  %v237_v10 = vld [vmem:[%s985_s26 + $0x48] sm:$0xff]  ;;  %v238_v11 = vld [vmem:[%s985_s26 + $0x50] sm:$0xff]  ;;  %v239_v12 = vld [vmem:[%s985_s26 + $0x58] sm:$0xff] }
  0x14   : > { %v240_v13 = vld [vmem:[%s985_s26 + $0x60] sm:$0xff]  ;;  %v241_v14 = vld [vmem:[%s985_s26 + $0x68] sm:$0xff]  ;;  %v242_v15 = vld [vmem:[%s985_s26 + $0x70] sm:$0xff] }
  0x15   : > { %v243_v16 = vld [vmem:[%s985_s26 + $0x78] sm:$0xff] }
  0x16   : > { %828 = vmatmul.mubr.msk.f32.gmra.mrb[2].mxu0 %vm252_vm0, %v231_v4 }
  0x17   : > { %830 = vmatprep.mubr.msk.f32.mxu0 %vm252_vm0, %v232_v5 }
  0x1a   : > { %831 = vmatmul.mubr.msk.f32.gmra.mrb[4].mxu0 %vm252_vm0, %v233_v6 }
  0x1b   : > { %833 = vmatprep.mubr.msk.f32.mxu0 %vm252_vm0, %v234_v7 }
  0x1e   : > { %834 = vmatmul.mubr.msk.f32.gmra.mrb[6].mxu0 %vm252_vm0, %v235_v8  ;;  %v766_v8 = vld [vmem:[%s1117_s4] ss:$0 sm:$0xff] }
  0x1f   : > { %836 = vmatprep.mubr.msk.f32.mxu0 %vm252_vm0, %v236_v9 }
  0x22   : > { %837 = vmatmul.mubr.msk.f32.gmra.mrb[8].mxu0 %vm252_vm0, %v237_v10 }
  0x23   : > { %839 = vmatprep.mubr.msk.f32.mxu0 %vm252_vm0, %v238_v11 }
  0x26   : > { %840 = vmatmul.mubr.msk.f32.gmra.mrb[10].mxu0 %vm252_vm0, %v239_v12 }
  0x27   : > { %842 = vmatprep.mubr.msk.f32.mxu0 %vm252_vm0, %v240_v13 }
  0x2a   : > { %843 = vmatmul.mubr.msk.f32.gmra.mrb[12].mxu0 %vm252_vm0, %v241_v14 }
  0x2b   : > { %845 = vmatprep.mubr.msk.f32.mxu0 %vm252_vm0, %v242_v15 }
  0x2e   : > { %846 = vmatmul.mubr.msk.f32.gmra.mrb[14].mxu0 %vm252_vm0, %v243_v16 }
  0xe5   : > { %v826_v24 = vpop.f32.mrb[0].mxu0 }
  0xe6   : > { %v373_v25 = vadd.f32 %v826_v24, %v1034_v23  ;;  %v367_v26 = vpop.f32.mrb[1].mxu0 }
  0xe7   : > { %v368_v27 = vadd.f32 %v1034_v23, %v367_v26 }
  0xe9   : > { %896 = vtanh.f32 %v368_v27  ;;  %v829_v28 = vpop.f32.mrb[2].mxu0 }
  0xea   : > { %898 = vtanh.f32 %v373_v25  ;;  %v383_v29 = vadd.f32 %v829_v28, %v1034_v23  ;;  %v377_v30 = vpop.f32.mrb[3].mxu0 }
  0xeb   : > { %v378_v31 = vadd.f32 %v1034_v23, %v377_v30 }
  0xed   : > { %900 = vtanh.f32 %v378_v31  ;;  %v832_v32 = vpop.f32.mrb[4].mxu0 }
  0xee   : > { %902 = vtanh.f32 %v383_v29  ;;  %v393_v33 = vadd.f32 %v832_v32, %v1034_v23  ;;  %v387_v34 = vpop.f32.mrb[5].mxu0 }
  0xef   : > { %v388_v35 = vadd.f32 %v1034_v23, %v387_v34 }
  0xf1   : > { %904 = vtanh.f32 %v388_v35  ;;  %v835_v36 = vpop.f32.mrb[6].mxu0 }
  0xf2   : > { %906 = vtanh.f32 %v393_v33  ;;  %v403_v37 = vadd.f32 %v835_v36, %v1034_v23  ;;  %v397_v38 = vpop.f32.mrb[7].mxu0 }
  0xf3   : > { %v897_v39 = vpop.eup %896  ;;  %v398_v40 = vadd.f32 %v1034_v23, %v397_v38 }
  0xf4   : > { %v899_v41 = vpop.eup %898  ;;  %856 = vmatprep.mubr.msk.f32.mxu1 %vm473_vm1, %v897_v39 }
  0xf5   : > { %908 = vtanh.f32 %v398_v40  ;;  %v838_v42 = vpop.f32.mrb[8].mxu0  ;;  %857 = vmatmul.mubr.msk.f32.vlgmr.msra.gmra.mrb[0].mxu1 %vm473_vm1, %v899_v41 }
  0xf6   : > { %910 = vtanh.f32 %v403_v37  ;;  %v413_v43 = vadd.f32 %v838_v42, %v1034_v23  ;;  %v407_v44 = vpop.f32.mrb[9].mxu0 }
  0xf7   : > { %v901_v45 = vpop.eup %900  ;;  %v408_v46 = vadd.f32 %v1034_v23, %v407_v44 }
  0xf8   : > { %v903_v47 = vpop.eup %902  ;;  %859 = vmatprep.mubr.msk.f32.mxu1 %vm473_vm1, %v901_v45 }
  0xf9   : > { %912 = vtanh.f32 %v408_v46  ;;  %v841_v48 = vpop.f32.mrb[10].mxu0  ;;  %860 = vmatmul.mubr.msk.f32.gmra.mrb[2].mxu1 %vm473_vm1, %v903_v47 }
  0xfa   : > { %914 = vtanh.f32 %v413_v43  ;;  %v423_v49 = vadd.f32 %v841_v48, %v1034_v23  ;;  %v417_v50 = vpop.f32.mrb[11].mxu0 }
  0xfb   : > { %v905_v51 = vpop.eup %904  ;;  %v418_v52 = vadd.f32 %v1034_v23, %v417_v50 }
  0xfc   : > { %v907_v53 = vpop.eup %906  ;;  %862 = vmatprep.mubr.msk.f32.mxu1 %vm473_vm1, %v905_v51 }
  0xfd   : > { %916 = vtanh.f32 %v418_v52  ;;  %v844_v54 = vpop.f32.mrb[12].mxu0  ;;  %863 = vmatmul.mubr.msk.f32.gmra.mrb[4].mxu1 %vm473_vm1, %v907_v53 }
  0xfe   : > { %918 = vtanh.f32 %v423_v49  ;;  %v433_v55 = vadd.f32 %v844_v54, %v1034_v23  ;;  %v427_v56 = vpop.f32.mrb[13].mxu0 }
  0xff   : > { %v909_v57 = vpop.eup %908  ;;  %v428_v58 = vadd.f32 %v1034_v23, %v427_v56 }
 0x100   : > { %v911_v59 = vpop.eup %910  ;;  %865 = vmatprep.mubr.msk.f32.mxu1 %vm473_vm1, %v909_v57 }
 0x101   : > { %920 = vtanh.f32 %v428_v58  ;;  %v847_v60 = vpop.f32.mrb[14].mxu0  ;;  %866 = vmatmul.mubr.msk.f32.gmra.mrb[6].mxu1 %vm473_vm1, %v911_v59 }
 0x102   : > { %922 = vtanh.f32 %v433_v55  ;;  %v443_v61 = vadd.f32 %v847_v60, %v1034_v23  ;;  %v437_v62 = vpop.f32.mrb[15].mxu0 }
 0x103   : > { %v913_v63 = vpop.eup %912  ;;  %v438_v0 = vadd.f32 %v1034_v23, %v437_v62 }
 0x104   : > { %v915_v1 = vpop.eup %914  ;;  %868 = vmatprep.mubr.msk.f32.mxu1 %vm473_vm1, %v913_v63 }
 0x105   : > { %924 = vtanh.f32 %v438_v0  ;;  %869 = vmatmul.mubr.msk.f32.gmra.mrb[8].mxu1 %vm473_vm1, %v915_v1 }
 0x106   : > { %926 = vtanh.f32 %v443_v61 }
 0x107   : > { %v917_v2 = vpop.eup %916 }
 0x108   : > { %v919_v3 = vpop.eup %918  ;;  %871 = vmatprep.mubr.msk.f32.mxu1 %vm473_vm1, %v917_v2 }
 0x109   : > { %872 = vmatmul.mubr.msk.f32.gmra.mrb[10].mxu1 %vm473_vm1, %v919_v3 }
 0x10b   : > { %v921_v4 = vpop.eup %920 }
 0x10c   : > { %v923_v5 = vpop.eup %922  ;;  %874 = vmatprep.mubr.msk.f32.mxu1 %vm473_vm1, %v921_v4 }
 0x10d   : > { %875 = vmatmul.mubr.msk.f32.gmra.mrb[12].mxu1 %vm473_vm1, %v923_v5 }
 0x10f   : > { %v925_v6 = vpop.eup %924 }
 0x110   : > { %v927_v7 = vpop.eup %926  ;;  %877 = vmatprep.mubr.msk.f32.mxu1 %vm473_vm1, %v925_v6 }
 0x111   : > { %878 = vmatmul.mubr.msk.f32.gmra.mrb[14].mxu1 %vm473_vm1, %v927_v7 }
 0x1c8   : > { %v858_v9 = vpop.f32.mrb[0].mxu1 }
 0x1c9   : > { %v594_v10 = vadd.f32 %v858_v9, %v766_v8  ;;  %v588_v11 = vpop.f32.mrb[1].mxu1 }
 0x1ca   : > { %v589_v12 = vadd.f32 %v766_v8, %v588_v11 }
 0x1cb   : > { %669 = vst.msk [vmem:[%s1076_s16 + $0x8] sm:$0xff] %vm667_vm2, %v594_v10 }
 0x1cc   : > { %668 = vst.msk [vmem:[%s1076_s16] sm:$0xff] %vm667_vm2, %v589_v12  ;;  %v861_v13 = vpop.f32.mrb[2].mxu1 }
 0x1cd   : > { %v604_v14 = vadd.f32 %v861_v13, %v766_v8  ;;  %v598_v15 = vpop.f32.mrb[3].mxu1 }
 0x1ce   : > { %v599_v16 = vadd.f32 %v766_v8, %v598_v15 }
 0x1cf   : > { %671 = vst.msk [vmem:[%s1076_s16 + $0x18] sm:$0xff] %vm667_vm2, %v604_v14 }
 0x1d0   : > { %670 = vst.msk [vmem:[%s1076_s16 + $0x10] sm:$0xff] %vm667_vm2, %v599_v16  ;;  %v864_v17 = vpop.f32.mrb[4].mxu1 }
 0x1d1   : > { %v614_v18 = vadd.f32 %v864_v17, %v766_v8  ;;  %v608_v19 = vpop.f32.mrb[5].mxu1 }
 0x1d2   : > { %v609_v20 = vadd.f32 %v766_v8, %v608_v19 }
 0x1d3   : > { %673 = vst.msk [vmem:[%s1076_s16 + $0x28] sm:$0xff] %vm667_vm2, %v614_v18 }
 0x1d4   : > { %672 = vst.msk [vmem:[%s1076_s16 + $0x20] sm:$0xff] %vm667_vm2, %v609_v20  ;;  %v867_v21 = vpop.f32.mrb[6].mxu1 }
 0x1d5   : > { %v624_v22 = vadd.f32 %v867_v21, %v766_v8  ;;  %v618_v23 = vpop.f32.mrb[7].mxu1 }
 0x1d6   : > { %v619_v24 = vadd.f32 %v766_v8, %v618_v23 }
 0x1d7   : > { %675 = vst.msk [vmem:[%s1076_s16 + $0x38] sm:$0xff] %vm667_vm2, %v624_v22 }
 0x1d8   : > { %674 = vst.msk [vmem:[%s1076_s16 + $0x30] sm:$0xff] %vm667_vm2, %v619_v24  ;;  %v870_v25 = vpop.f32.mrb[8].mxu1 }
 0x1d9   : > { %v634_v26 = vadd.f32 %v870_v25, %v766_v8  ;;  %v628_v27 = vpop.f32.mrb[9].mxu1 }
 0x1da   : > { %v629_v28 = vadd.f32 %v766_v8, %v628_v27 }
 0x1db   : > { %677 = vst.msk [vmem:[%s1076_s16 + $0x48] sm:$0xff] %vm667_vm2, %v634_v26 }
 0x1dc   : > { %676 = vst.msk [vmem:[%s1076_s16 + $0x40] sm:$0xff] %vm667_vm2, %v629_v28  ;;  %v873_v29 = vpop.f32.mrb[10].mxu1 }
 0x1dd   : > { %v644_v30 = vadd.f32 %v873_v29, %v766_v8  ;;  %v638_v31 = vpop.f32.mrb[11].mxu1 }
 0x1de   : > { %v639_v32 = vadd.f32 %v766_v8, %v638_v31 }
 0x1df   : > { %679 = vst.msk [vmem:[%s1076_s16 + $0x58] sm:$0xff] %vm667_vm2, %v644_v30 }
 0x1e0   : > { %678 = vst.msk [vmem:[%s1076_s16 + $0x50] sm:$0xff] %vm667_vm2, %v639_v32  ;;  %v876_v33 = vpop.f32.mrb[12].mxu1 }
 0x1e1   : > { %v654_v34 = vadd.f32 %v876_v33, %v766_v8  ;;  %v648_v35 = vpop.f32.mrb[13].mxu1 }
 0x1e2   : > { %v649_v36 = vadd.f32 %v766_v8, %v648_v35 }
 0x1e3   : > { %681 = vst.msk [vmem:[%s1076_s16 + $0x68] sm:$0xff] %vm667_vm2, %v654_v34 }
 0x1e4   : > { %680 = vst.msk [vmem:[%s1076_s16 + $0x60] sm:$0xff] %vm667_vm2, %v649_v36  ;;  %v879_v37 = vpop.f32.mrb[14].mxu1 }
 0x1e5   : > { %v664_v38 = vadd.f32 %v879_v37, %v766_v8  ;;  %v658_v39 = vpop.f32.mrb[15].mxu1 }
 0x1e6   : > { %v659_v40 = vadd.f32 %v766_v8, %v658_v39 }
 0x1e7   : > { %683 = vst.msk [vmem:[%s1076_s16 + $0x78] sm:$0xff] %vm667_vm2, %v664_v38 }
 0x1e8   : > { %682 = vst.msk [vmem:[%s1076_s16 + $0x70] sm:$0xff] %vm667_vm2, %v659_v40 }
 0x1e9 PF: > { %s15_s18 = sadd.s32 1, %s934_s18  }
 0x1ea   : > { %p12_p4 = scmp.ge.s32.totalorder %s15_s18, 4  }
 0x1ec   :  { %14 = sbr.rel (!%p12_p4) target bundleno = 1 (0x1), region = 70 }

</bundles_post_ra>
